<compile_context>
chip_gen: v5e
topology: v5e:2x2
jax: 0.10.0
libtpu: 0.0.40
codegen_flags: <defaults>
</compile_context>

<pallas_src>
import jax
import jax.numpy as jnp
import numpy as np
from jax.experimental import pallas as pl
from jax.experimental.pallas import tpu as pltpu


def _make_biattention_kernel(BT, K, Q, G, return_logits):
    KQ = K * Q

    def kernel(v_ref, q_ref, wv_ref, bv_ref, wq_ref, bq_ref,
               hmat_ref, hbias_ref, *out_refs):
        p_ref = out_refs[0]
        logits_ref = out_refs[1] if return_logits else None

        v = v_ref[...]                                  # (BT, K, VDIM)  f32
        q = q_ref[...]                                  # (BT, Q, QDIM)  f32
        VDIM = v.shape[-1]
        QDIM = q.shape[-1]
        DP = wv_ref.shape[-1]                           # padded projection width

        # --- FCNet = weight_norm(Linear) + ReLU (eval-mode dropout = identity) ---
        # One fat projection matmul per block: bf16 MXU operands, f32 accumulation,
        # f32 elementwise (bias add / ReLU).
        v2 = v.reshape(BT * K, VDIM).astype(jnp.bfloat16)
        q2 = q.reshape(BT * Q, QDIM).astype(jnp.bfloat16)
        vproj = jnp.maximum(
            jnp.dot(v2, wv_ref[...], preferred_element_type=jnp.float32)
            + bv_ref[...], 0.0).reshape(BT, K, DP)                       # f32
        qproj = jnp.maximum(
            jnp.dot(q2, wq_ref[...], preferred_element_type=jnp.float32)
            + bq_ref[...], 0.0).reshape(BT, Q, DP)                       # f32
        qproj_b = qproj.astype(jnp.bfloat16)

        hmat = hmat_ref[...]                            # (G, DP) f32

        # all-zero object rows -> -inf logits (matches masked_fill_ on logits)
        vmask = jnp.sum(jnp.abs(v), axis=-1, keepdims=True) == 0.0       # (BT, K, 1)

        p_parts, logit_parts = [], []
        for g in range(G):   # G is tiny & static: unroll; no (G,K,D) broadcast/reshape
            vg = (vproj * hmat[g][None, None, :]).astype(jnp.bfloat16)   # (BT, K, DP)
            lg = jnp.einsum('bkd,bqd->bkq', vg, qproj_b,
                            preferred_element_type=jnp.float32)          # (BT, K, Q)
            lg = jnp.where(vmask, -jnp.inf, lg)
            lg = lg.reshape(BT, KQ)                     # lane-dense (K*Q) slab
            # softmax over the flattened K*Q positions; the per-glimpse bias is a
            # constant over that axis, so it is shift-invariant for the softmax.
            m = jnp.max(lg, axis=-1, keepdims=True)
            e = jnp.exp(lg - m)
            s = jnp.sum(e, axis=-1, keepdims=True)
            p_parts.append(e * pl.reciprocal(s, approx=True))
            logit_parts.append(lg)

        p_ref[...] = jnp.stack(p_parts, axis=1)                          # (BT, G, K*Q)
        if return_logits:
            hb = hbias_ref[...][None, :, :]                              # (1, G, 1)
            # -inf + bias = -inf, so masked entries stay masked.
            logits_ref[...] = jnp.stack(logit_parts, axis=1) + hb

    return kernel


def _pad_last(x, dp):
    pad = dp - x.shape[-1]
    if pad == 0:
        return x
    return jnp.pad(x, [(0, 0)] * (x.ndim - 1) + [(0, pad)])


def _choose_block_batch(B, K, Q, target_rows=256):
    """Largest divisor of B keeping BT*max(K,Q) near the MXU M dimension,
    preferring at least 2 grid steps (v7x megacore / pipelining)."""
    cap = max(1, target_rows // max(K, Q, 1))
    bt = 1
    for cand in range(1, B + 1):
        if B % cand == 0 and cand <= cap:
            bt = cand
    if B // bt < 2:
        for cand in range(bt - 1, 0, -1):
            if B % cand == 0 and B // cand >= 2:
                return cand
    return bt


def biattention_forward(v, q, params, *, return_logits=True, block_batch=None):
    B, K, VDIM = v.shape
    _, Q, QDIM = q.shape
    G, D = params["hmat"].shape
    DP = ((D + 127) // 128) * 128    # lane-align the projection width (zero padding)

    # Weights: pre-transposed [in, out], zero-padded columns, bf16 MXU operands.
    wv_t = _pad_last(params["wv_t"].astype(jnp.float32), DP).astype(jnp.bfloat16)
    wq_t = _pad_last(params["wq_t"].astype(jnp.float32), DP).astype(jnp.bfloat16)
    bv = _pad_last(params["bv"].reshape(1, D).astype(jnp.float32), DP)
    bq = _pad_last(params["bq"].reshape(1, D).astype(jnp.float32), DP)
    hmat = _pad_last(params["hmat"].astype(jnp.float32), DP)
    hbias = params["hbias"].reshape(G, 1).astype(jnp.float32)

    BT = block_batch if block_batch is not None else _choose_block_batch(B, K, Q)
    assert B % BT == 0, "block_batch must divide the batch size"
    grid = (B // BT,)

    kernel = _make_biattention_kernel(BT, K, Q, G, return_logits)

    out_shapes = [jax.ShapeDtypeStruct((B, G, K * Q), jnp.float32)]
    out_specs = [pl.BlockSpec((BT, G, K * Q), lambda b: (b, 0, 0))]
    if return_logits:
        out_shapes.append(jax.ShapeDtypeStruct((B, G, K * Q), jnp.float32))
        out_specs.append(pl.BlockSpec((BT, G, K * Q), lambda b: (b, 0, 0)))

    grid_spec = pltpu.PrefetchScalarGridSpec(
        num_scalar_prefetch=0,
        grid=grid,
        in_specs=[
            pl.BlockSpec((BT, K, VDIM), lambda b: (b, 0, 0)),   # v (f32, mask needs it)
            pl.BlockSpec((BT, Q, QDIM), lambda b: (b, 0, 0)),   # q (f32)
            pl.BlockSpec((VDIM, DP), lambda b: (0, 0)),         # Wv^T  (bf16)
            pl.BlockSpec((1, DP), lambda b: (0, 0)),            # bv    (f32)
            pl.BlockSpec((QDIM, DP), lambda b: (0, 0)),         # Wq^T  (bf16)
            pl.BlockSpec((1, DP), lambda b: (0, 0)),            # bq    (f32)
            pl.BlockSpec((G, DP), lambda b: (0, 0)),            # h_mat (f32)
            pl.BlockSpec((G, 1), lambda b: (0, 0)),             # h_bias(f32)
        ],
        out_specs=out_specs,
    )

    outs = pl.pallas_call(
        kernel,
        out_shape=tuple(out_shapes),
        grid_spec=grid_spec,
        compiler_params=pltpu.CompilerParams(dimension_semantics=("parallel",)),
    )(v.astype(jnp.float32), q.astype(jnp.float32), wv_t, bv, wq_t, bq, hmat, hbias)

    p = outs[0].reshape(B, G, K, Q)
    if return_logits:
        return p, outs[1].reshape(B, G, K, Q)
    return p


def reference_forward(v, q, params):
    """Pure-JAX reference mirroring the kernel's bf16 MXU-operand casts."""
    wv = params["wv_t"].astype(jnp.bfloat16)
    wq = params["wq_t"].astype(jnp.bfloat16)
    vproj = jax.nn.relu(
        jnp.einsum('bkv,vd->bkd', v.astype(jnp.bfloat16), wv,
                   preferred_element_type=jnp.float32) + params["bv"])
    qproj = jax.nn.relu(
        jnp.einsum('bqv,vd->bqd', q.astype(jnp.bfloat16), wq,
                   preferred_element_type=jnp.float32) + params["bq"])
    vh = (vproj[:, None, :, :] * params["hmat"][None, :, None, :]).astype(jnp.bfloat16)
    logits = jnp.einsum('bgkd,bqd->bgkq', vh, qproj.astype(jnp.bfloat16),
                        preferred_element_type=jnp.float32)
    logits = logits + params["hbias"].reshape(1, -1, 1, 1)
    vm = (jnp.sum(jnp.abs(v), axis=-1) == 0.0)[:, None, :, None]
    logits = jnp.where(vm, -jnp.inf, logits)
    B, G, K, Q = logits.shape
    p = jax.nn.softmax(logits.reshape(B, G, K * Q), axis=-1).reshape(B, G, K, Q)
    return p, logits


if __name__ == "__main__":
    # Small shapes consistent with the module:
    #   x_dim (v_dim)=32, y_dim (q_dim)=32, z_dim=16, k=3 -> D = z_dim*3 = 48, glimpse=2
    B, K, Q = 2, 8, 8
    VDIM, QDIM, ZDIM, GLIMPSE = 32, 32, 16, 2
    D = ZDIM * 3

    key = jax.random.PRNGKey(0)
    k_v, k_q, k_wv, k_bv, k_wq, k_bq, k_hm, k_hb = jax.random.split(key, 8)

    v = jax.random.normal(k_v, (B, K, VDIM), dtype=jnp.float32)
    q = jax.random.normal(k_q, (B, Q, QDIM), dtype=jnp.float32)
    # zero out a couple of object rows to exercise the v_mask path
    v = v.at[0, 3].set(0.0)
    v = v.at[1, 5].set(0.0)

    # Deterministic synthetic parameters (weight_norm at init is value-preserving).
    # TODO(synk): dropout (p=[0.2, 0.5]) is a train-time stochastic op; eval-mode identity is used.
    params = {
        "wv_t": 0.1 * jax.random.normal(k_wv, (VDIM, D), dtype=jnp.float32),
        "bv":   0.1 * jax.random.normal(k_bv, (1, D), dtype=jnp.float32),
        "wq_t": 0.1 * jax.random.normal(k_wq, (QDIM, D), dtype=jnp.float32),
        "bq":   0.1 * jax.random.normal(k_bq, (1, D), dtype=jnp.float32),
        "hmat": jax.random.normal(k_hm, (GLIMPSE, D), dtype=jnp.float32),
        "hbias": jax.random.normal(k_hb, (GLIMPSE, 1), dtype=jnp.float32),
    }

    p_out, logits_out = biattention_forward(v, q, params)
    jax.block_until_ready((p_out, logits_out))

    p_ref, logits_ref = reference_forward(v, q, params)
    assert p_out.shape == (B, GLIMPSE, K, Q) and logits_out.shape == (B, GLIMPSE, K, Q)
    assert np.allclose(np.asarray(logits_out), np.asarray(logits_ref), atol=2e-3, rtol=2e-3)
    assert np.allclose(np.asarray(p_out), np.asarray(p_ref), atol=2e-3, rtol=2e-2)

    print("KERNEL_OK")
</pallas_src>

<mosaic_0001>
module attributes {stable_mosaic.version = 11 : i64} {
  func.func @kernel(%arg0: i32, %arg1: memref<1x8x32xf32, #tpu.memory_space<vmem>>, %arg2: memref<1x8x32xf32, #tpu.memory_space<vmem>>, %arg3: memref<32x128xbf16, #tpu.memory_space<vmem>>, %arg4: memref<1x128xf32, #tpu.memory_space<vmem>>, %arg5: memref<32x128xbf16, #tpu.memory_space<vmem>>, %arg6: memref<1x128xf32, #tpu.memory_space<vmem>>, %arg7: memref<2x128xf32, #tpu.memory_space<vmem>>, %arg8: memref<2x1xf32, #tpu.memory_space<vmem>>, %arg9: memref<1x2x64xf32, #tpu.memory_space<vmem>>, %arg10: memref<1x2x64xf32, #tpu.memory_space<vmem>>) attributes {dimension_semantics = [#tpu.dimension_semantics<parallel>], iteration_bounds = array<i64: 2>, scalar_prefetch = 0 : i64, scratch_operands = 0 : i64, tpu.core_type = #tpu.core_type<tc>, window_params = [{transform_indices = @transform_0, window_bounds = array<i64: 1, 8, 32>}, {transform_indices = @transform_1, window_bounds = array<i64: 1, 8, 32>}, {pipeline_mode = #tpu.pipeline_mode<synchronous>, transform_indices = @transform_2, window_bounds = array<i64: 32, 128>}, {pipeline_mode = #tpu.pipeline_mode<synchronous>, transform_indices = @transform_3, window_bounds = array<i64: 1, 128>}, {pipeline_mode = #tpu.pipeline_mode<synchronous>, transform_indices = @transform_4, window_bounds = array<i64: 32, 128>}, {pipeline_mode = #tpu.pipeline_mode<synchronous>, transform_indices = @transform_5, window_bounds = array<i64: 1, 128>}, {pipeline_mode = #tpu.pipeline_mode<synchronous>, transform_indices = @transform_6, window_bounds = array<i64: 2, 128>}, {pipeline_mode = #tpu.pipeline_mode<synchronous>, transform_indices = @transform_7, window_bounds = array<i64: 2, 1>}, {transform_indices = @transform_8, window_bounds = array<i64: 1, 2, 64>}, {transform_indices = @transform_9, window_bounds = array<i64: 1, 2, 64>}]} {
    %c0 = arith.constant 0 : index
    %c0_0 = arith.constant 0 : index
    %c0_1 = arith.constant 0 : index
    %0 = vector.load %arg1[%c0, %c0_0, %c0_1] : memref<1x8x32xf32, #tpu.memory_space<vmem>>, vector<1x8x32xf32>
    %c0_2 = arith.constant 0 : index
    %c0_3 = arith.constant 0 : index
    %c0_4 = arith.constant 0 : index
    %1 = vector.load %arg2[%c0_2, %c0_3, %c0_4] : memref<1x8x32xf32, #tpu.memory_space<vmem>>, vector<1x8x32xf32>
    %2 = vector.shape_cast %0 : vector<1x8x32xf32> to vector<8x32xf32>
    %3 = arith.truncf %2 : vector<8x32xf32> to vector<8x32xbf16>
    %4 = vector.shape_cast %1 : vector<1x8x32xf32> to vector<8x32xf32>
    %5 = arith.truncf %4 : vector<8x32xf32> to vector<8x32xbf16>
    %c0_5 = arith.constant 0 : index
    %c0_6 = arith.constant 0 : index
    %6 = vector.load %arg3[%c0_5, %c0_6] : memref<32x128xbf16, #tpu.memory_space<vmem>>, vector<32x128xbf16>
    %cst = arith.constant dense<0.000000e+00> : vector<8x128xf32>
    %7 = tpu.matmul %3, %6, %cst {dimension_numbers = #tpu.dot_dimension_numbers<[1], [0], [0], [1], [0, 0, 1, 1], [], []>} : vector<8x32xbf16>, vector<32x128xbf16>, vector<8x128xf32> -> vector<8x128xf32>
    %c0_7 = arith.constant 0 : index
    %c0_8 = arith.constant 0 : index
    %8 = vector.load %arg4[%c0_7, %c0_8] : memref<1x128xf32, #tpu.memory_space<vmem>>, vector<1x128xf32>
    %9 = vector.broadcast %8 : vector<1x128xf32> to vector<8x128xf32>
    %10 = arith.addf %7, %9 : vector<8x128xf32>
    %cst_9 = arith.constant 0.000000e+00 : f32
    %11 = vector.broadcast %cst_9 : f32 to vector<8x128xf32>
    %12 = arith.maximumf %10, %11 : vector<8x128xf32>
    %13 = vector.shape_cast %12 : vector<8x128xf32> to vector<1x8x128xf32>
    %c0_10 = arith.constant 0 : index
    %c0_11 = arith.constant 0 : index
    %14 = vector.load %arg5[%c0_10, %c0_11] : memref<32x128xbf16, #tpu.memory_space<vmem>>, vector<32x128xbf16>
    %cst_12 = arith.constant dense<0.000000e+00> : vector<8x128xf32>
    %15 = tpu.matmul %5, %14, %cst_12 {dimension_numbers = #tpu.dot_dimension_numbers<[1], [0], [0], [1], [0, 0, 1, 1], [], []>} : vector<8x32xbf16>, vector<32x128xbf16>, vector<8x128xf32> -> vector<8x128xf32>
    %c0_13 = arith.constant 0 : index
    %c0_14 = arith.constant 0 : index
    %16 = vector.load %arg6[%c0_13, %c0_14] : memref<1x128xf32, #tpu.memory_space<vmem>>, vector<1x128xf32>
    %17 = vector.broadcast %16 : vector<1x128xf32> to vector<8x128xf32>
    %18 = arith.addf %15, %17 : vector<8x128xf32>
    %cst_15 = arith.constant 0.000000e+00 : f32
    %19 = vector.broadcast %cst_15 : f32 to vector<8x128xf32>
    %20 = arith.maximumf %18, %19 : vector<8x128xf32>
    %21 = vector.shape_cast %20 : vector<8x128xf32> to vector<1x8x128xf32>
    %22 = arith.truncf %21 : vector<1x8x128xf32> to vector<1x8x128xbf16>
    %c0_16 = arith.constant 0 : index
    %c0_17 = arith.constant 0 : index
    %23 = vector.load %arg7[%c0_16, %c0_17] : memref<2x128xf32, #tpu.memory_space<vmem>>, vector<2x128xf32>
    %24 = math.absf %0 : vector<1x8x32xf32>
    %cst_18 = arith.constant dense<0.000000e+00> : vector<1x8xf32>
    %25 = vector.multi_reduction <add>, %24, %cst_18 [2] : vector<1x8x32xf32> to vector<1x8xf32>
    %26 = vector.shape_cast %25 : vector<1x8xf32> to vector<1x8x1xf32>
    %cst_19 = arith.constant 0.000000e+00 : f32
    %27 = vector.broadcast %cst_19 : f32 to vector<1x8x1xf32>
    %28 = arith.cmpf oeq, %26, %27 : vector<1x8x1xf32>
    %29 = vector.extract_strided_slice %23 {offsets = [0, 0], sizes = [1, 128], strides = [1, 1]} : vector<2x128xf32> to vector<1x128xf32>
    %30 = vector.shape_cast %29 : vector<1x128xf32> to vector<128xf32>
    %31 = vector.shape_cast %30 : vector<128xf32> to vector<1x1x128xf32>
    %32 = vector.broadcast %31 : vector<1x1x128xf32> to vector<1x8x128xf32>
    %33 = arith.mulf %13, %32 : vector<1x8x128xf32>
    %34 = arith.truncf %33 : vector<1x8x128xf32> to vector<1x8x128xbf16>
    "tpu.trace_start"() <{level = 10 : i32, message = "bkd,bqd->bkq"}> : () -> ()
    %cst_20 = arith.constant dense<0.000000e+00> : vector<1x8x8xf32>
    %35 = tpu.matmul %34, %22, %cst_20 {dimension_numbers = #tpu.dot_dimension_numbers<[2], [2], [1], [1], [0, 0, 0, 1, 1, 1], [0], [0]>} : vector<1x8x128xbf16>, vector<1x8x128xbf16>, vector<1x8x8xf32> -> vector<1x8x8xf32>
    %cst_21 = arith.constant 0xFF800000 : f32
    "tpu.trace_stop"() : () -> ()
    %36 = vector.shape_cast %28 : vector<1x8x1xi1> to vector<1x8x1xi1>
    %37 = vector.broadcast %36 : vector<1x8x1xi1> to vector<1x8x8xi1>
    %38 = vector.broadcast %cst_21 : f32 to vector<1x8x8xf32>
    %39 = arith.select %37, %38, %35 : vector<1x8x8xi1>, vector<1x8x8xf32>
    %40 = vector.shape_cast %39 : vector<1x8x8xf32> to vector<1x64xf32>
    %cst_22 = arith.constant dense<0xFF800000> : vector<1xf32>
    %41 = vector.multi_reduction <maximumf>, %40, %cst_22 [1] : vector<1x64xf32> to vector<1xf32>
    %42 = vector.shape_cast %41 : vector<1xf32> to vector<1x1xf32>
    %43 = vector.broadcast %42 : vector<1x1xf32> to vector<1x64xf32>
    %44 = arith.subf %40, %43 : vector<1x64xf32>
    %45 = math.exp %44 : vector<1x64xf32>
    %cst_23 = arith.constant dense<0.000000e+00> : vector<1xf32>
    %46 = vector.multi_reduction <add>, %45, %cst_23 [1] : vector<1x64xf32> to vector<1xf32>
    %47 = vector.shape_cast %46 : vector<1xf32> to vector<1x1xf32>
    %48 = tpu.reciprocal %47 {approx = true} : vector<1x1xf32> -> vector<1x1xf32>
    %49 = vector.broadcast %48 : vector<1x1xf32> to vector<1x64xf32>
    %50 = arith.mulf %45, %49 : vector<1x64xf32>
    %51 = vector.extract_strided_slice %23 {offsets = [1, 0], sizes = [1, 128], strides = [1, 1]} : vector<2x128xf32> to vector<1x128xf32>
    %52 = vector.shape_cast %51 : vector<1x128xf32> to vector<128xf32>
    %53 = vector.shape_cast %52 : vector<128xf32> to vector<1x1x128xf32>
    %54 = vector.broadcast %53 : vector<1x1x128xf32> to vector<1x8x128xf32>
    %55 = arith.mulf %13, %54 : vector<1x8x128xf32>
    %56 = arith.truncf %55 : vector<1x8x128xf32> to vector<1x8x128xbf16>
    "tpu.trace_start"() <{level = 10 : i32, message = "bkd,bqd->bkq"}> : () -> ()
    %cst_24 = arith.constant dense<0.000000e+00> : vector<1x8x8xf32>
    %57 = tpu.matmul %56, %22, %cst_24 {dimension_numbers = #tpu.dot_dimension_numbers<[2], [2], [1], [1], [0, 0, 0, 1, 1, 1], [0], [0]>} : vector<1x8x128xbf16>, vector<1x8x128xbf16>, vector<1x8x8xf32> -> vector<1x8x8xf32>
    %cst_25 = arith.constant 0xFF800000 : f32
    "tpu.trace_stop"() : () -> ()
    %58 = vector.shape_cast %28 : vector<1x8x1xi1> to vector<1x8x1xi1>
    %59 = vector.broadcast %58 : vector<1x8x1xi1> to vector<1x8x8xi1>
    %60 = vector.broadcast %cst_25 : f32 to vector<1x8x8xf32>
    %61 = arith.select %59, %60, %57 : vector<1x8x8xi1>, vector<1x8x8xf32>
    %62 = vector.shape_cast %61 : vector<1x8x8xf32> to vector<1x64xf32>
    %cst_26 = arith.constant dense<0xFF800000> : vector<1xf32>
    %63 = vector.multi_reduction <maximumf>, %62, %cst_26 [1] : vector<1x64xf32> to vector<1xf32>
    %64 = vector.shape_cast %63 : vector<1xf32> to vector<1x1xf32>
    %65 = vector.broadcast %64 : vector<1x1xf32> to vector<1x64xf32>
    %66 = arith.subf %62, %65 : vector<1x64xf32>
    %67 = math.exp %66 : vector<1x64xf32>
    %cst_27 = arith.constant dense<0.000000e+00> : vector<1xf32>
    %68 = vector.multi_reduction <add>, %67, %cst_27 [1] : vector<1x64xf32> to vector<1xf32>
    %69 = vector.shape_cast %68 : vector<1xf32> to vector<1x1xf32>
    %70 = tpu.reciprocal %69 {approx = true} : vector<1x1xf32> -> vector<1x1xf32>
    %71 = vector.broadcast %70 : vector<1x1xf32> to vector<1x64xf32>
    %72 = arith.mulf %67, %71 : vector<1x64xf32>
    %73 = vector.shape_cast %50 : vector<1x64xf32> to vector<1x1x64xf32>
    %74 = vector.shape_cast %72 : vector<1x64xf32> to vector<1x1x64xf32>
    %75 = tpu.concatenate %73, %74 in 1 : vector<1x1x64xf32>, vector<1x1x64xf32> -> vector<1x2x64xf32>
    %c0_28 = arith.constant 0 : index
    %c0_29 = arith.constant 0 : index
    %c0_30 = arith.constant 0 : index
    %76 = vector.load %arg9[%c0_28, %c0_29, %c0_30] : memref<1x2x64xf32, #tpu.memory_space<vmem>>, vector<1x2x64xf32>
    tpu.vector_store %arg9[%c0_28, %c0_29, %c0_30], %75 {strides = array<i32>} : memref<1x2x64xf32, #tpu.memory_space<vmem>>, vector<1x2x64xf32>,
    %c0_31 = arith.constant 0 : index
    %c0_32 = arith.constant 0 : index
    %77 = vector.load %arg8[%c0_31, %c0_32] : memref<2x1xf32, #tpu.memory_space<vmem>>, vector<2x1xf32>
    %78 = vector.shape_cast %77 : vector<2x1xf32> to vector<1x2x1xf32>
    %79 = vector.shape_cast %40 : vector<1x64xf32> to vector<1x1x64xf32>
    %80 = vector.shape_cast %62 : vector<1x64xf32> to vector<1x1x64xf32>
    %81 = tpu.concatenate %79, %80 in 1 : vector<1x1x64xf32>, vector<1x1x64xf32> -> vector<1x2x64xf32>
    %82 = vector.broadcast %78 : vector<1x2x1xf32> to vector<1x2x64xf32>
    %83 = arith.addf %81, %82 : vector<1x2x64xf32>
    %c0_33 = arith.constant 0 : index
    %c0_34 = arith.constant 0 : index
    %c0_35 = arith.constant 0 : index
    %84 = vector.load %arg10[%c0_33, %c0_34, %c0_35] : memref<1x2x64xf32, #tpu.memory_space<vmem>>, vector<1x2x64xf32>
    tpu.vector_store %arg10[%c0_33, %c0_34, %c0_35], %83 {strides = array<i32>} : memref<1x2x64xf32, #tpu.memory_space<vmem>>, vector<1x2x64xf32>,
    return
  }
  func.func @transform_0(%arg0: i32) -> (i32, i32, i32) {
    %c0_i32 = arith.constant 0 : i32
    %c0_i32_0 = arith.constant 0 : i32
    %c0_i32_1 = arith.constant 0 : i32
    return %arg0, %c0_i32, %c0_i32_0 : i32, i32, i32
  }
  func.func @transform_1(%arg0: i32) -> (i32, i32, i32) {
    %c0_i32 = arith.constant 0 : i32
    %c0_i32_0 = arith.constant 0 : i32
    %c0_i32_1 = arith.constant 0 : i32
    return %arg0, %c0_i32, %c0_i32_0 : i32, i32, i32
  }
  func.func @transform_2(%arg0: i32) -> (i32, i32) {
    %c0_i32 = arith.constant 0 : i32
    %c0_i32_0 = arith.constant 0 : i32
    %c0_i32_1 = arith.constant 0 : i32
    return %c0_i32, %c0_i32_0 : i32, i32
  }
  func.func @transform_3(%arg0: i32) -> (i32, i32) {
    %c0_i32 = arith.constant 0 : i32
    %c0_i32_0 = arith.constant 0 : i32
    %c0_i32_1 = arith.constant 0 : i32
    return %c0_i32, %c0_i32_0 : i32, i32
  }
  func.func @transform_4(%arg0: i32) -> (i32, i32) {
    %c0_i32 = arith.constant 0 : i32
    %c0_i32_0 = arith.constant 0 : i32
    %c0_i32_1 = arith.constant 0 : i32
    return %c0_i32, %c0_i32_0 : i32, i32
  }
  func.func @transform_5(%arg0: i32) -> (i32, i32) {
    %c0_i32 = arith.constant 0 : i32
    %c0_i32_0 = arith.constant 0 : i32
    %c0_i32_1 = arith.constant 0 : i32
    return %c0_i32, %c0_i32_0 : i32, i32
  }
  func.func @transform_6(%arg0: i32) -> (i32, i32) {
    %c0_i32 = arith.constant 0 : i32
    %c0_i32_0 = arith.constant 0 : i32
    %c0_i32_1 = arith.constant 0 : i32
    return %c0_i32, %c0_i32_0 : i32, i32
  }
  func.func @transform_7(%arg0: i32) -> (i32, i32) {
    %c0_i32 = arith.constant 0 : i32
    %c0_i32_0 = arith.constant 0 : i32
    %c0_i32_1 = arith.constant 0 : i32
    return %c0_i32, %c0_i32_0 : i32, i32
  }
  func.func @transform_8(%arg0: i32) -> (i32, i32, i32) {
    %c0_i32 = arith.constant 0 : i32
    %c0_i32_0 = arith.constant 0 : i32
    %c0_i32_1 = arith.constant 0 : i32
    return %arg0, %c0_i32, %c0_i32_0 : i32, i32, i32
  }
  func.func @transform_9(%arg0: i32) -> (i32, i32, i32) {
    %c0_i32 = arith.constant 0 : i32
    %c0_i32_0 = arith.constant 0 : i32
    %c0_i32_1 = arith.constant 0 : i32
    return %arg0, %c0_i32, %c0_i32_0 : i32, i32, i32
  }
}

</mosaic_0001>

<bundles_post_ra>
// kernel: tpu_custom_call.1
= control target key start
LH: loop header
LB: loop body
LE: loop exit
PB: predicated region body
PF: predicated region fallthrough
CT: control target
= control target key end

     0   :  { %s1629_s0 = inlined_call_operand.hbm [shape: f32[2,8,32], index: 0, kind: input, shape index: {}]   ;;  %s1630_s1 = inlined_call_operand.hbm [shape: f32[2,8,32], index: 1, kind: input, shape index: {}]   ;;  %s1631_s2 = inlined_call_operand.hbm [shape: bf16[32,128], index: 2, kind: input, shape index: {}]   ;;  %s1632_s3 = inlined_call_operand.vmem [shape: f32[1,128], index: 3, kind: input, shape index: {}]   ;;  %s1633_s4 = inlined_call_operand.hbm [shape: bf16[32,128], index: 4, kind: input, shape index: {}]   ;;  %s1634_s5 = inlined_call_operand.vmem [shape: f32[1,128], index: 5, kind: input, shape index: {}]   ;;  %s1635_s6 = inlined_call_operand.vmem [shape: f32[2,128], index: 6, kind: input, shape index: {}]   ;;  %s1636_s7 = inlined_call_operand.vmem [shape: f32[2,1], index: 7, kind: input, shape index: {}]   ;;  %s1637_s8 = inlined_call_operand.hbm [shape: f32[2,2,64], index: 8, kind: output, shape index: {0}]   ;;  %s1638_s9 = inlined_call_operand.hbm [shape: f32[2,2,64], index: 9, kind: output, shape index: {1}]  }
   0x1   :  { %1645 = sst [smem:[#allocation25_spill]] %s1631_s2 }
   0x2   :  { %1646 = sst [smem:[#allocation26_spill]] %s1633_s4 }
   0x3   :  { %15 = vsyncpa [#allocation3], 0 }
   0x4   :  { %17 = vsyncpa [#allocation3 + $0x1], 0 }
   0x5   :  { %18 = vsyncpa [#allocation6], 0 }
   0x6   :  { %20 = vsyncpa [#allocation6 + $0x1], 0 }
   0x7   :  { %21 = vsyncpa [#allocation9], 0 }
   0x8   :  { %22 = vsyncpa [#allocation4], 0 }
   0x9   :  { %24 = vsyncpa [#allocation4 + $0x1], 0 }
   0xa   :  { %25 = vsyncpa [#allocation12], 0 }
   0xb   :  { %27 = vsyncpa [#allocation12 + $0x1], 0  ;;  %s1371_s30 = smov 0   ;;  %s1373_s10 = smov 0  }
   0xc   :  { %s1375_s11 = smov 0   ;;  %s1377_s12 = smov 0  }
   0xd LB: > { %1647 = sst [smem:[#allocation19_spill]] %s1293_s30  ;;  %s1395_s16 = sadd.s32 4294967295, %s1305_s12   ;;  %s1305_s12 = sphi %s1377_s12, %s1665_s12   ;;  %s1301_s11 = sphi %s1375_s11, %s1667_s11   ;;  %s1297_s10 = sphi %s1373_s10, %s1669_s10   ;;  %s1293_s30 = sphi %s1371_s30, %s1668_s30  }
   0xe   : > { %1648 = sst [smem:[#allocation20_spill]] %s1301_s11  ;;  %p932_p0 = scmp.ge.s32.totalorder %s1305_s12, 1 }
   0xf   : > { %1649 = sst [smem:[#allocation21_spill]] %s1305_s12  ;;  %p54_p1 = scmp.eq.s32.totalorder %s1395_s16, 0 }
  0x10   : > { %s1650_s2 = sld [smem:[#allocation25_spill]]  ;;  %p268_p2 = scmp.lt.s32.totalorder %s1305_s12, 3 }
  0x11   : > { %s1307_s18 = smov [#allocation7]   ;;  %s1652_s4 = sld [smem:[#allocation26_spill]] }
  0x12   : > { %p1400_p3 = pnand %p932_p0, %p268_p2  ;;  %s281_s19 = sshll.u32 %s1307_s18, 4  ;;  %s282_s19 = int_to_ptr.vmem [resolvable:$true] %s281_s19 }
  0x13   : > { %s1308_s23 = smov [#allocation8]   ;;  %s1309_s25 = smov 64  }
  0x14   : > { %p991_p4 = pneg %p1400_p3  ;;  %s298_s24 = sshll.u32 %s1308_s23, 4  ;;  %s299_s24 = int_to_ptr.vmem [resolvable:$true] %s298_s24 }
  0x15   : > { %s1310_s26 = smov 4   ;;  %s931_s27 = sadd.s32 4294967294, %s1305_s12  }
  0x16   : > { %s279_s15 = sshll.u32 %s1650_s2, 4  ;;  %p992_p6 = pnand %p991_p4, %p54_p1  ;;  %s280_s15 = int_to_ptr.hbm [resolvable:$true] %s279_s15 }
  0x17   : > { %s296_s22 = sshll.u32 %s1652_s4, 4  ;;  %s1414_s28 = sadd.s32 1, %s1305_s12   ;;  %s297_s22 = int_to_ptr.hbm [resolvable:$true] %s296_s22 }
  0x18   : > { %994 = dma.hbm_to_vmem [thread:$0]  (!%p992_p6), %s280_s15, 256, %s282_s19, [#allocation6], %s1309_s25, %s1309_s25, %s1310_s26  }
  0x19   : > { %997 = dma.hbm_to_vmem [thread:$0]  (!%p992_p6), %s297_s22, 256, %s299_s24, [#allocation9], %s1309_s25, %s1309_s25, %s1310_s26  }
  0x1a   : > { %1653 = sst [smem:[#allocation22_spill]] %s1414_s28  ;;  %s37_s29 = ssub.s32 %s1305_s12, %s1414_s28 }
  0x1b   : > { %s40_s13 = sadd.s32 1, %s1301_s11  ;;  %p38_p7 = scmp.eq.s32.totalorder %s37_s29, 0 }
  0x1c   : > { %p47_p8 = scmp.ne.s32.totalorder %s1301_s11, %s1297_s10  ;;  %p48_p9 = scmp.eq.s32.totalorder %s1305_s12, 0 }
  0x1d   : > { %p53_p10 = scmp.ne.s32.totalorder %s1297_s10, %s1293_s30  ;;  %p229_p13 = scmp.eq.s32.totalorder %s1395_s16, 1 }
  0x1e   : > { %s1425_s14 = scalar_select %p38_p7, %s1301_s11, %s40_s13  }
  0x1f   : > { %p1427_p11 = por %p48_p9, %p47_p8  ;;  %p1433_p12 = por %p54_p1, %p53_p10 }
  0x20   : > { %1654 = sst [smem:[#allocation23_spill]] %s1425_s14  ;;  %p235_p0 = scmp.eq.s32.totalorder %s931_s27, 1 }
  0x21   : > { %p1014_p2 = scmp.lt.s32.totalorder %s1305_s12, 2  ;;  %s321_s19 = sand.u32 1, %s1301_s11  }
  0x22   : > { %p1440_p4 = por %p229_p13, %p47_p8  ;;  %p1444_p6 = por %p235_p0, %p53_p10 }
  0x23   : > { %s1448_s22 = sshll.u32 %s321_s19, 3  ;;  %s937_s23 = sshll.u32 %s1305_s12, 3 }
  0x24   : > { %s1658_s21 = scalar_select %p1444_p6, 1, 0 }
  0x25   : > { %s329_s26 = scalar_lea.hbm %s1629_s0, %s937_s23  ;;  %s325_s29 = scalar_lea.vmem [#allocation2], %s1448_s22 }
  0x26   : > { %1659 = sst [smem:[#allocation24_spill]] %s1658_s21  ;;  %s333_s27 = sshll.u32 %s325_s29, 4  ;;  %s334_s27 = int_to_ptr.vmem [resolvable:$true] %s333_s27 }
  0x27   : > { %s331_s13 = sshll.u32 %s329_s26, 4  ;;  %p1457_p7 = pnand %p1014_p2, %p1427_p11  ;;  %s332_s13 = int_to_ptr.hbm [resolvable:$true] %s331_s13 }
  0x28   : > { %s348_s11 = scalar_lea.hbm %s1630_s1, %s937_s23  ;;  %s340_s28 = sand.u32 1, %s1305_s12  }
  0x29   : > { %s322_s21 = scalar_lea.sflag [#allocation3], %s321_s19  ;;  %s1135_s24 = sshra.s32 %s332_s13, 4  ;;  %s1136_s24 = int_to_ptr.hbm [resolvable:$true] %s1135_s24 }
  0x2a   : > { %s1137_s25 = scalar_lea.hbm %s1136_s24, 8  ;;  %p1139_p9 = pneg %p1457_p7 }
  0x2b   : > { %p1138_p8 = scmp.ne.s32.totalorder %s1136_s24, %s1137_s25  ;;  %s1142_s29 = scalar_lea.hbm %s1629_s0, 16 }
  0x2c   : > { %p1143_p13 = scmp.lt.s32.totalorder %s1136_s24, %s1629_s0  ;;  %p1144_p0 = scmp.lt.s32.totalorder %s1142_s29, %s1137_s25 }
  0x2d   : > { %p1140_p10 = pnand %p1139_p9, %p1138_p8 }
  0x2e   : > { %p1145_p2 = por %p1144_p0, %p1143_p13 }
  0x2f   : > { %p1141_p11 = pneg %p1140_p10 }
  0x31   : > { %p1146_p5 = pnand %p1145_p2, %p1141_p11 }
  0x33   : > { %1149 = shalt.err (!%p1146_p5)
}
  0x34   : > { %1001 = dma.hbm_to_vmem [thread:$0]  (!%p1457_p7), %s332_s13, 128, %s334_s27, %s322_s21  }
  0x35   : > { %s350_s19 = sshll.u32 %s348_s11, 4  ;;  %s344_s23 = scalar_lea.vmem [#allocation5], %s1448_s22  ;;  %s351_s19 = int_to_ptr.hbm [resolvable:$true] %s350_s19 }
  0x36   : > { %s352_s12 = sshll.u32 %s344_s23, 4  ;;  %s341_s18 = scalar_lea.sflag [#allocation6], %s340_s28  ;;  %s353_s12 = int_to_ptr.vmem [resolvable:$true] %s352_s12 }
  0x37   : > { %s1165_s26 = sshra.s32 %s351_s19, 4  ;;  %s1172_s29 = scalar_lea.hbm %s1630_s1, 16  ;;  %s1166_s26 = int_to_ptr.hbm [resolvable:$true] %s1165_s26 }
  0x38   : > { %s1167_s30 = scalar_lea.hbm %s1166_s26, 8  ;;  %p1173_p5 = scmp.lt.s32.totalorder %s1166_s26, %s1630_s1 }
  0x39   : > { %p1168_p8 = scmp.ne.s32.totalorder %s1166_s26, %s1167_s30  ;;  %p1174_p13 = scmp.lt.s32.totalorder %s1172_s29, %s1167_s30 }
  0x3b   : > { %p1170_p10 = pnand %p1168_p8, %p1139_p9  ;;  %p1175_p0 = por %p1174_p13, %p1173_p5 }
  0x3d   : > { %p1171_p11 = pneg %p1170_p10 }
  0x3f   : > { %p1176_p2 = pnand %p1175_p0, %p1171_p11 }
  0x41   : > { %1179 = shalt.err (!%p1176_p2)
}
  0x42   : > { %1004 = dma.hbm_to_vmem [thread:$0]  (!%p1457_p7), %s351_s19, 128, %s353_s12, %s341_s18  }
  0x43   : > { %361 = sbr.rel (%p1400_p3) target bundleno = 781 (0x30d), region = 52  ;;  %s1493_s11 = sand.u32 (!%p1400_p3), 1, %s1297_s10  }
  0x44   : > { %s941_s28 = sshll.u32 (!%p1400_p3), %s1493_s11, 3  ;;  %s364_s22 = scalar_lea.sflag (!%p1400_p3), [#allocation3], %s1493_s11 }
  0x45   : > { %s367_s27 = scalar_lea.vmem (!%p1400_p3), [#allocation2], %s941_s28 }
  0x48   : > { %1268 = dma.done.wait (%p1433_p12), %s364_s22, 128  }
  0x49   : > { %1270 = vsyncadd (%p1433_p12), %s364_s22, 4294967168  ;;  %s373_s2 = sand.u32 1, %s1395_s16   ;;  %s377_s12 = scalar_lea.vmem [#allocation5], %s941_s28 }
  0x4a   : > { %s374_s30 = scalar_lea.sflag [#allocation6], %s373_s2 }
  0x4b   : > { %1272 = dma.done.wait (%p1433_p12), %s374_s30, 128  }
  0x4c   : > { %1274 = vsyncadd (%p1433_p12), %s374_s30, 4294967168 }
  0x4d   : > { %1276 = dma.done.wait (%p54_p1), [#allocation6], 256  }
  0x4e   : > { %1278 = vsyncadd (%p54_p1), [#allocation6], 4294967040 }
  0x4f   : > { %1280 = dma.done.wait (%p54_p1), [#allocation9], 256  }
  0x50   : > { %1282 = vsyncadd (%p54_p1), [#allocation9], 4294967040  ;;  %v972_v0 = vld [vmem:[#allocation7 + $0x8] sm:$0xff]  ;;  %v974_v1 = vld [vmem:[#allocation8 + $0x8] sm:$0xff]  ;;  %vm458_vm0 = vcmask 261120   ;;  %vm540_vm2 = vcmask 1047556  }
  0x51   : > { %v971_v2 = vld [vmem:[#allocation7] sm:$0xff]  ;;  %v973_v3 = vld [vmem:[#allocation8] sm:$0xff]  ;;  %468 = vmatpush.bf16.msra.mxu0 %v972_v0  ;;  %505 = vmatpush.bf16.msra.mxu1 %v974_v1  ;;  %v1311_v28 = vmov 1983009808   ;;  %v1312_v31 = vmov 1934713408  }
  0x52   : > { %v434_v4 = vld [vmem:[%s367_s27] sm:$0xff]  ;;  %v435_v5 = vld [vmem:[%s377_s12] sm:$0xff]  ;;  %v543_v29 = vunpack.c.l.s4 %v1311_v28  ;;  %v553_v32 = vunpack.c.l.s4 %v1312_v31  ;;  %s1313_s18 = smov 8   ;;  %s1314_s26 = smov 16   ;;  %vm606_vm3 = vcmask 64512   ;;  %vm608_vm4 = vcmask 130048  }
  0x53   : > { %v436_v6 = vpack.c.bf16 %v434_v4, %v434_v4  ;;  %v437_v7 = vpack.c.bf16 %v435_v5, %v435_v5  ;;  %v515_v8 = vand.u32 2147483647, %v434_v4  ;;  %v1065_v10 = vld [vmem:[%s1632_s3] ss:$0 sm:$0xff]  ;;  %s1315_s24 = smov 48   ;;  %s1316_s25 = smov 32  }
  0x54   : > { %v1066_v11 = vld [vmem:[%s1634_s5] ss:$0 sm:$0xff]  ;;  %v544_v33 = vunpack.c.0.s8 %v543_v29  ;;  %v554_v37 = vunpack.c.0.s8 %v553_v32  ;;  %s1317_s29 = smov 24   ;;  %s1318_s4 = smov 40   ;;  %vm610_vm5 = vcmask 195584   ;;  %vm613_vm6 = vcmask 326656  }
  0x55   : > { %469 = vmatpush.bf16.msra.mxu0 %v971_v2  ;;  %506 = vmatpush.bf16.msra.mxu1 %v973_v3  ;;  %v516_v9 = vsel %vm458_vm0, %v515_v8, 0.0  ;;  %v514_v12 = vld [vmem:[%s1635_s6] sm:$0x3]  ;;  %s1319_s21 = smov 56   ;;  %vm615_vm7 = vcmask 392192   ;;  %vm617_vm8 = vcmask 457728  }
  0x56   : > { %517 = vadd.xlane.f32.xlu0 %v516_v9  ;;  %v520_v17 = vperm.slane %v514_v12, 0  ;;  %v631_v18 = vperm.slane %v514_v12, 1  ;;  %vm619_vm9 = vcmask 516096   ;;  %s967_s27 = sshll.u32 %s1395_s16, 1  ;;  %s945_s2 = sshll.u32 %s1493_s11, 1  ;;  %vm735_vm10 = vcmask 1040384  }
  0x57   : > { %s781_s17 = scalar_lea.hbm %s1638_s9, %s967_s27  ;;  %s432_s15 = scalar_lea.vmem [#allocation11], %s945_s2  ;;  %vm737_vm11 = vcmask 517120  }
  0x58   : > { %955 = vmatmul.msk.bf16.vlgmr.msra.gmra.mxu0 %vm458_vm0, %v436_v6  ;;  %964 = vmatmul.msk.bf16.vlgmr.msra.gmra.mxu1 %vm458_vm0, %v437_v7  ;;  %s783_s13 = sshll.u32 %s432_s15, 4  ;;  %s785_s14 = sshll.u32 %s781_s17, 4  ;;  %s784_s13 = int_to_ptr.vmem [resolvable:$true] %s783_s13  ;;  %s786_s14 = int_to_ptr.hbm [resolvable:$true] %s785_s14 }
  0x59   : > { %s757_s19 = scalar_lea.sflag [#allocation12], %s1493_s11  ;;  %s1209_s23 = sshra.s32 %s786_s14, 4  ;;  %s1210_s23 = int_to_ptr.hbm [resolvable:$true] %s1209_s23 }
  0x5a   : > { %p1216_p7 = scmp.lt.s32.totalorder %s1210_s23, %s1638_s9 }
  0xc9   : > { %v518_v30 = vpop.xlane.xlu0 %517 }
  0xca   : > { %vm519_vm1 = vcmp.eq.f32.partialorder %v518_v30, 0.0 }
  0xd5   : > { %v471_v13 = vpop.f32.mrf.mxu0  ;;  %v508_v14 = vpop.f32.mrf.mxu1 }
  0xd6   : > { %v472_v15 = vadd.f32 %v1065_v10, %v471_v13  ;;  %v509_v16 = vadd.f32 %v1066_v11, %v508_v14 }
  0xd8   : > { %v475_v19 = vmax.f32 %v472_v15, 0.0  ;;  %v512_v20 = vmax.f32 %v509_v16, 0.0 }
  0xda   : > { %v513_v21 = vpack.c.bf16 %v512_v20, %v512_v20  ;;  %v521_v22 = vmul.f32 %v520_v17, %v475_v19  ;;  %v632_v23 = vmul.f32 %v631_v18, %v475_v19 }
  0xdc   : > { %530 = vmatpush.bf16.xpose.msra.mxu2 %v513_v21  ;;  %641 = vmatpush.bf16.xpose.msra.mxu3 %v513_v21  ;;  %v522_v26 = vpack.c.bf16 %v521_v22, %v521_v22  ;;  %v633_v27 = vpack.c.bf16 %v632_v23, %v632_v23  ;;  %v1320_v22 = vmov 0  }
  0xdd   : > { %v473_v24 = vpop.f32.mrf.mxu0  ;;  %v510_v25 = vpop.f32.mrf.mxu1  ;;  %1064 = vset.pattern.permute.xlu0 %v1320_v22 }
  0xe3   : > { %531 = vmatmul.bf16.vlgmr.msra.gmra.mxu2 %v522_v26  ;;  %642 = vmatmul.bf16.vlgmr.msra.gmra.mxu3 %v633_v27 }
 0x166   : > { %v532_v34 = vpop.f32.mrf.mxu2  ;;  %v643_v35 = vpop.f32.mrf.mxu3 }
 0x167   : > { %v538_v36 = vsel %vm519_vm1, -inf, %v532_v34  ;;  %v647_v38 = vsel %vm519_vm1, -inf, %v643_v35 }
 0x168   : > { %v545_v39 = vperm.slane %v538_v36, %v544_v33  ;;  %v648_v40 = vrot.slane %v647_v38, 4  ;;  %v653_v41 = vperm.slane %v647_v38, %v544_v33  ;;  %v539_v47 = vrot.slane %v538_v36, 4 }
 0x16a   : > { %v550_v42 = vrot.slane %v545_v39, 4  ;;  %v649_v43 = vsel %vm540_vm2, 0.0, %v648_v40  ;;  %v658_v45 = vrot.slane %v653_v41, 4  ;;  %v1527_v46 = vperm.slane %v653_v41, %v554_v37 }
 0x16b   : > { %v657_v44 = vperm.slane %v649_v43, %v544_v33  ;;  %v1532_v55 = vperm.slane %v545_v39, %v554_v37  ;;  %v541_v58 = vsel %vm540_vm2, 0.0, %v539_v47 }
 0x16c   : > { %v551_v48 = vsel %vm540_vm2, 0.0, %v550_v42  ;;  %v678_v49 = vrot.slane %v1527_v46, 4  ;;  %v659_v50 = vsel %vm540_vm2, 0.0, %v658_v45  ;;  %v549_v59 = vperm.slane %v541_v58, %v544_v33 }
 0x16d   : > { %v667_v53 = vperm.slane %v659_v50, %v554_v37  ;;  %v559_v54 = vperm.slane %v551_v48, %v554_v37  ;;  %v668_v56 = vrot.slane %v657_v44, 4  ;;  %v570_v61 = vrot.slane %v1532_v55, 4  ;;  %v739_v48 = vld [vmem:[%s1636_s7] sm:$0x3] }
 0x16e   : > { %v534_v51 = vpop.f32.mrf.mxu2  ;;  %v645_v52 = vpop.f32.mrf.mxu3  ;;  %v679_v57 = vsel %vm540_vm2, 0.0, %v678_v49  ;;  %v560_v63 = vrot.slane %v549_v59, 4  ;;  %v565_v1 = vperm.slane %v549_v59, %v554_v37  ;;  %v673_v4 = vperm.slane %v657_v44, %v554_v37 }
 0x16f   : > { %687 = vrot.lane.b32.xlu0 %v679_v57, %s1313_s18  ;;  %691 = vrot.lane.b32.xlu1 %v667_v53, %s1314_s26  ;;  %v669_v60 = vsel %vm540_vm2, 0.0, %v668_v56  ;;  %v571_v0 = vsel %vm540_vm2, 0.0, %v570_v61  ;;  %v680_v3 = vrot.slane %v667_v53, 4  ;;  %v572_v8 = vrot.slane %v559_v54, 4 }
 0x170   : > { %583 = vrot.lane.b32.xlu2 %v559_v54, %s1314_s26  ;;  %v677_v62 = vperm.slane %v669_v60, %v554_v37  ;;  %v561_v2 = vsel %vm540_vm2, 0.0, %v560_v63  ;;  %v682_v7 = vrot.slane %v673_v4, 4  ;;  %v574_v11 = vrot.slane %v565_v1, 4 }
 0x171   : > { %v569_v5 = vperm.slane %v561_v2, %v554_v37  ;;  %v681_v6 = vsel %vm540_vm2, 0.0, %v680_v3  ;;  %v573_v10 = vsel %vm540_vm2, 0.0, %v572_v8 }
 0x172   : > { %v683_v9 = vsel %vm540_vm2, 0.0, %v682_v7  ;;  %v684_v12 = vrot.slane %v677_v62, 4  ;;  %v575_v13 = vsel %vm540_vm2, 0.0, %v574_v11 }
 0x173   : > { %v576_v15 = vrot.slane %v569_v5, 4 }
 0x174   : > { %v685_v14 = vsel %vm540_vm2, 0.0, %v684_v12 }
 0x175   : > { %v577_v16 = vsel %vm540_vm2, 0.0, %v576_v15 }
 0x177   : > { %707 = vrot.lane.b32.xlu0 %v677_v62, %s1315_s24  ;;  %579 = vrot.lane.b32.xlu1 %v571_v0, %s1313_s18  ;;  %s1211_s18 = scalar_lea.hbm %s1210_s23, 2 }
 0x178   : > { %591 = vrot.lane.b32.xlu2 %v565_v1, %s1316_s25  ;;  %p1212_p1 = scmp.ne.s32.totalorder %s1210_s23, %s1211_s18 }
 0x17a   : > { %p1213_p3 = pnand %p1212_p1, %p1440_p4 }
 0x17c   : > { %p1214_p12 = pneg %p1213_p3 }
 0x17f   : > { %699 = vrot.lane.b32.xlu1 %v673_v4, %s1316_s25  ;;  %599 = vrot.lane.b32.xlu0 %v569_v5, %s1315_s24  ;;  %s1215_s25 = scalar_lea.hbm %s1638_s9, 4 }
 0x180   : > { %695 = vrot.lane.b32.xlu2 %v681_v6, %s1317_s29  ;;  %p1217_p9 = scmp.lt.s32.totalorder %s1215_s25, %s1211_s18 }
 0x182   : > { %p1218_p8 = por %p1217_p9, %p1216_p7 }
 0x184   : > { %p1219_p10 = pnand %p1218_p8, %p1214_p12 }
 0x187   : > { %703 = vrot.lane.b32.xlu1 %v683_v9, %s1318_s4 }
 0x188   : > { %587 = vrot.lane.b32.xlu2 %v573_v10, %s1317_s29 }
 0x18f   : > { %595 = vrot.lane.b32.xlu1 %v575_v13, %s1318_s4 }
 0x190   : > { %711 = vrot.lane.b32.xlu2 %v685_v14, %s1319_s21 }
 0x197   : > { %603 = vrot.lane.b32.xlu1 %v577_v16, %s1319_s21 }
 0x1ca   : > { %v584_v17 = vpop.permute.xlu2 %583 }
 0x1d2   : > { %v592_v18 = vpop.permute.xlu2 %591 }
 0x1da   : > { %v696_v20 = vpop.permute.xlu2 %695 }
 0x1e1   : > { %v692_v19 = vpop.permute.xlu1 %691  ;;  %v688_v23 = vpop.permute.xlu0 %687 }
 0x1e2   : > { %v588_v24 = vpop.permute.xlu2 %587  ;;  %v714_v26 = vsel %vm606_vm3, %v1527_v46, %v688_v23 }
 0x1e3   : > { %v715_v27 = vsel %vm608_vm4, %v714_v26, %v692_v19 }
 0x1e4   : > { %v716_v28 = vsel %vm610_vm5, %v715_v27, %v696_v20 }
 0x1e9   : > { %v580_v21 = vpop.permute.xlu1 %579  ;;  %v708_v31 = vpop.permute.xlu0 %707 }
 0x1ea   : > { %v712_v33 = vpop.permute.xlu2 %711  ;;  %v607_v35 = vsel %vm606_vm3, %v1532_v55, %v580_v21 }
 0x1eb   : > { %v609_v38 = vsel %vm608_vm4, %v607_v35, %v584_v17 }
 0x1ec   : > { %v611_v40 = vsel %vm610_vm5, %v609_v38, %v588_v24 }
 0x1ed   : > { %v612_v41 = vsel %vm458_vm0, %v611_v40, %v592_v18 }
 0x1f1   : > { %v700_v25 = vpop.permute.xlu1 %699  ;;  %v600_v43 = vpop.permute.xlu0 %599 }
 0x1f2   : > { %v717_v29 = vsel %vm458_vm0, %v716_v28, %v700_v25 }
 0x1f9   : > { %v704_v30 = vpop.permute.xlu1 %703 }
 0x1fa   : > { %v718_v32 = vsel %vm613_vm6, %v717_v29, %v704_v30 }
 0x1fb   : > { %v719_v34 = vsel %vm615_vm7, %v718_v32, %v708_v31 }
 0x1fc   : > { %v720_v36 = vsel %vm617_vm8, %v719_v34, %v712_v33 }
 0x1fd   : > { %v721_v37 = vsel %vm619_vm9, %v720_v36, -inf  ;;  %v741_v59 = vrot.slane %v720_v36, 7 }
 0x1fe   : > { %722 = vmax.xlane.f32.xlu2 %v721_v37 }
 0x201   : > { %v596_v39 = vpop.permute.xlu1 %595 }
 0x202   : > { %v614_v42 = vsel %vm613_vm6, %v612_v41, %v596_v39 }
 0x203   : > { %v616_v44 = vsel %vm615_vm7, %v614_v42, %v600_v43 }
 0x209   : > { %v604_v45 = vpop.permute.xlu1 %603 }
 0x20a   : > { %v618_v46 = vsel %vm617_vm8, %v616_v44, %v604_v45 }
 0x20b   : > { %v620_v47 = vsel %vm619_vm9, %v618_v46, -inf  ;;  %v743_v60 = vsel %vm735_vm10, %v618_v46, %v741_v59 }
 0x20c   : > { %621 = vmax.xlane.f32.xlu0 %v620_v47 }
 0x220   : > { %746 = vperm.xlu0 %1064, %v739_v48  }
 0x271   : > { %v723_v49 = vpop.xlane.xlu2 %722 }
 0x272   : > { %v724_v50 = vsub.f32 %v720_v36, %v723_v49 }
 0x274   : > { %v725_v51 = vmul.f32 1.442695, %v724_v50 }
 0x276   : > { %1067 = vpow2.f32 %v725_v51 }
 0x27c   : > { %v1068_v52 = vpop.eup %1067 }
 0x27d   : > { %v727_v53 = vsel %vm619_vm9, %v1068_v52, 0.0 }
 0x27e   : > { %728 = vadd.xlane.f32.xlu1 %v727_v53 }
 0x27f   : > { %v622_v54 = vpop.xlane.xlu0 %621 }
 0x280   : > { %v623_v55 = vsub.f32 %v618_v46, %v622_v54 }
 0x282   : > { %v624_v56 = vmul.f32 1.442695, %v623_v55 }
 0x284   : > { %1069 = vpow2.f32 %v624_v56 }
 0x28a   : > { %v1070_v57 = vpop.eup %1069 }
 0x28b   : > { %v626_v58 = vsel %vm619_vm9, %v1070_v57, 0.0 }
 0x28c   : > { %627 = vadd.xlane.f32.xlu2 %v626_v58 }
 0x292   : > { %v747_v61 = vpop.permute.xlu0 %746 }
 0x293   : > { %v749_v62 = vadd.f32 %v747_v61, %v743_v60 }
 0x295   : > { %750 = vst.msk [vmem:[%s432_s15] sm:$0x3] %vm737_vm11, %v749_v62 }
 0x296   : > { %1222 = shalt.err (!%p1219_p10)
}
 0x297   : > { %988 = dma.vmem_to_hbm [thread:$0]  (%p1440_p4), %s784_s13, 32, %s786_s14, %s757_s19  }
 0x298   : > { %s767_s22 = scalar_lea.hbm %s1637_s8, %s967_s27  ;;  %s425_s30 = scalar_lea.vmem [#allocation10], %s945_s2 }
 0x299   : > { %s769_s12 = sshll.u32 %s425_s30, 4  ;;  %s771_s17 = sshll.u32 %s767_s22, 4  ;;  %s770_s12 = int_to_ptr.vmem [resolvable:$true] %s769_s12  ;;  %s772_s17 = int_to_ptr.hbm [resolvable:$true] %s771_s17 }
 0x29a   : > { %s752_s16 = scalar_lea.sflag [#allocation4], %s1493_s11  ;;  %s1237_s15 = sshra.s32 %s772_s17, 4  ;;  %s1238_s15 = int_to_ptr.hbm [resolvable:$true] %s1237_s15 }
 0x29b   : > { %s1239_s13 = scalar_lea.hbm %s1238_s15, 2  ;;  %s1243_s14 = scalar_lea.hbm %s1637_s8, 4 }
 0x29c   : > { %p1240_p11 = scmp.ne.s32.totalorder %s1238_s15, %s1239_s13  ;;  %p1244_p0 = scmp.lt.s32.totalorder %s1238_s15, %s1637_s8 }
 0x29d   : > { %p1245_p2 = scmp.lt.s32.totalorder %s1243_s14, %s1239_s13 }
 0x29e   : > { %p1241_p5 = pnand %p1240_p11, %p1440_p4 }
 0x29f   : > { %p1246_p1 = por %p1245_p2, %p1244_p0 }
 0x2a0   : > { %p1242_p13 = pneg %p1241_p5 }
 0x2a2   : > { %p1247_p3 = pnand %p1246_p1, %p1242_p13 }
 0x2f1   : > { %v729_v63 = vpop.xlane.xlu1 %728 }
 0x2f2   : > { %1071 = vrcp.f32 %v729_v63 }
 0x2f8   : > { %v1072_v1 = vpop.eup %1071 }
 0x2f9   : > { %v731_v2 = vmul.f32 %v1072_v1, %v1068_v52 }
 0x2fb   : > { %v733_v4 = vrot.slane %v731_v2, 7 }
 0x2ff   : > { %v628_v0 = vpop.xlane.xlu2 %627 }
 0x300   : > { %1073 = vrcp.f32 %v628_v0 }
 0x306   : > { %v1074_v3 = vpop.eup %1073 }
 0x307   : > { %v630_v5 = vmul.f32 %v1074_v3, %v1070_v57 }
 0x309   : > { %v736_v6 = vsel %vm735_vm10, %v630_v5, %v733_v4 }
 0x30a   : > { %738 = vst.msk [vmem:[%s425_s30] sm:$0x3] %vm737_vm11, %v736_v6 }
 0x30b   : > { %1250 = shalt.err (!%p1247_p3)
}
 0x30c   : > { %987 = dma.vmem_to_hbm [thread:$0]  (%p1440_p4), %s770_s12, 32, %s772_s17, %s752_s16  }
 0x30d PF: > { %s1661_s11 = sld [smem:[#allocation19_spill]] }
 0x30e   : > { %s1663_s26 = sld [smem:[#allocation21_spill]] }
 0x313   : > { %s797_s24 = sand.u32 1, %s1661_s11  }
 0x314   : > { %p1664_p12 = scmp.ge.s32.totalorder %s1663_s26, 2  ;;  %s798_s25 = scalar_lea.sflag [#allocation4], %s797_s24 }
 0x316   : > { %p1006_p7 = pnand %p1664_p12, %p1444_p6 }
 0x318   : > { %p1007_p9 = pneg %p1006_p7 }
 0x31a   : > { %1284 = dma.done.wait (%p1007_p9), %s798_s25, 32  }
 0x31b   : > { %1286 = vsyncadd (%p1007_p9), %s798_s25, 4294967264  ;;  %s808_s29 = scalar_lea.sflag [#allocation12], %s797_s24 }
 0x31c   : > { %1288 = dma.done.wait (%p1007_p9), %s808_s29, 32  }
 0x31d   : > { %1290 = vsyncadd (%p1007_p9), %s808_s29, 4294967264  ;;  %s1665_s12 = sld [smem:[#allocation22_spill]]  ;;  %s1668_s30 = smov %s1297_s10 }
 0x31e   : > { %s1666_s4 = sld [smem:[#allocation20_spill]] }
 0x31f   : > { %s1667_s11 = sld [smem:[#allocation23_spill]] }
 0x323   : > { %p30_p4 = scmp.ge.s32.totalorder %s1665_s12, 4  }
 0x324   : > { %s1669_s10 = smov %s1666_s4 }
 0x325   :  { %32 = sbr.rel (!%p30_p4) target bundleno = 13 (0xd), region = 135 }
 0x32a   :  { %814 = vsyncpa [#allocation3], 1 }
 0x32b   :  { %816 = vsyncpa [#allocation3 + $0x1], 1 }
 0x32c   :  { %817 = vsyncpa [#allocation6], 1 }
 0x32d   :  { %819 = vsyncpa [#allocation6 + $0x1], 1 }
 0x32e   :  { %820 = vsyncpa [#allocation9], 1 }
 0x32f   :  { %821 = vsyncpa [#allocation4], 1 }
 0x330   :  { %823 = vsyncpa [#allocation4 + $0x1], 1 }
 0x331   :  { %824 = vsyncpa [#allocation12], 1 }
 0x332   :  { %826 = vsyncpa [#allocation12 + $0x1], 1 }

</bundles_post_ra>
